<compile_context>
chip_gen: v6e
topology: v6e:2x2x1
jax: 0.10.0
libtpu: 0.0.40
codegen_flags: <defaults>
</compile_context>

<pallas_src>
import functools

import numpy as np
import jax
import jax.numpy as jnp
from jax.experimental import pallas as pl
from jax.experimental.pallas import tpu as pltpu

PAR_PRIMITIVES = ['none', 'max_pool_3x3', 'avg_pool_3x3', 'skip_connect',
                  'sep_conv_3x3', 'sep_conv_5x5', 'dil_conv_3x3', 'dil_conv_5x5']

_BN_EPS = 1e-5


def _make_compiler_params():
    """Generation-aware VMEM budget (v7x: 64 MiB physical, v5e/v6e: 128 MiB)."""
    cap = None
    try:
        info = pltpu.get_tpu_info()
        for name in ("vmem_capacity_bytes", "vmem_size_bytes", "vmem_bytes"):
            cap = getattr(info, name, None)
            if cap:
                break
    except Exception:
        cap = None
    if not cap:
        cap = 128 * 1024 * 1024
    limit = int(min(max(cap - 16 * 1024 * 1024, 32 * 1024 * 1024), 100 * 1024 * 1024))
    return pltpu.CompilerParams(dimension_semantics=("arbitrary",),
                                vmem_limit_bytes=limit)


_COMPILER_PARAMS = _make_compiler_params()


# ----------------------------- in-kernel helpers ----------------------------

def _bn_rows(y, count, mask=None):
    """Per-row (per-channel) train-mode BatchNorm over the lane axis.

    Two-pass (shifted) variance.  If `mask` (1, M) is given, statistics only
    count positions where mask==1 (count = number of valid positions) and
    invalid positions are zeroed in the output.
    """
    if mask is not None:
        y = y * mask
    mean = jnp.sum(y, axis=-1, keepdims=True) * (1.0 / count)
    c = y - mean
    if mask is not None:
        c = c * mask
    var = jnp.sum(c * c, axis=-1, keepdims=True) * (1.0 / count)
    return c * jax.lax.rsqrt(var + _BN_EPS)


def _dw_accum(x, dw, offsets, width):
    """Depthwise conv in the padded frame: one shifted FMA per tap (VPU only).

    x: (C, width) f32 padded frame.  dw: (C, kk) f32 (kk on lanes).
    offsets[t] = i*dilation*Wp + j*dilation; valid output positions read
    in-image values only, wrapped lanes land on masked-out positions.
    """
    acc = None
    for t, off in enumerate(offsets):
        tap = x if off == 0 else pltpu.roll(x, shift=width - off, axis=1)
        term = tap * dw[:, t:t + 1]
        acc = term if acc is None else acc + term
    return acc


# --------------------------------- kernels ----------------------------------

def _matmul_bn_kernel(w_ref, x_ref, o_ref, *, relu, bn, count):
    """(Cout,K)bf16 @ (K,M)bf16 -> (Cout,M)f32, optional input ReLU + fused BN."""
    x = x_ref[...]
    if relu:
        x = jnp.maximum(x, 0)
    y = jnp.dot(w_ref[...], x, preferred_element_type=jnp.float32)
    if bn:
        y = _bn_rows(y, count)
    o_ref[...] = y


def _dw_pw_bn_kernel(x_ref, dw_ref, pw_ref, mask_ref, o_ref,
                     *, relu, offsets, width, count):
    """[ReLU ->] depthwise (in-register taps) -> 1x1 MXU matmul -> masked BN."""
    x = x_ref[...].astype(jnp.float32)
    if relu:
        x = jnp.maximum(x, 0.0)
    z = _dw_accum(x, dw_ref[...], offsets, width)
    y = jnp.dot(pw_ref[...], z.astype(jnp.bfloat16),
                preferred_element_type=jnp.float32)
    o_ref[...] = _bn_rows(y, count, mask_ref[...])


def _sep2_bn_kernel(x_ref, dw1_ref, pw1_ref, dw2_ref, pw2_ref, mask_ref, o_ref,
                    *, offsets, width, count, off0):
    """Stride-1 SepConv fully fused: ReLU->dw->pw->BN->ReLU->dw->pw->BN.

    The stage-1 result is re-framed for stage 2 with one roll (the masked BN has
    already zeroed every non-valid position, so the roll lands a correctly
    zero-padded stage-2 input); the intermediate never leaves VMEM/vregs.
    """
    mask = mask_ref[...]
    x = jnp.maximum(x_ref[...].astype(jnp.float32), 0.0)
    z1 = _dw_accum(x, dw1_ref[...], offsets, width)
    y1 = jnp.dot(pw1_ref[...], z1.astype(jnp.bfloat16),
                 preferred_element_type=jnp.float32)
    y1 = _bn_rows(y1, count, mask)                  # zeros outside the valid block
    x2 = pltpu.roll(y1, shift=off0, axis=1)         # shift valid block into interior
    x2 = jnp.maximum(x2, 0.0)
    z2 = _dw_accum(x2, dw2_ref[...], offsets, width)
    y2 = jnp.dot(pw2_ref[...], z2.astype(jnp.bfloat16),
                 preferred_element_type=jnp.float32)
    o_ref[...] = _bn_rows(y2, count, mask)


def _max_pool_bn_kernel(x_ref, mask_ref, o_ref, *, offsets, width, count):
    x = x_ref[...]
    r = x
    for off in offsets:
        if off:
            r = jnp.maximum(r, pltpu.roll(x, shift=width - off, axis=1))
    mask = mask_ref[...]
    y = jnp.where(mask > 0, r, 0.0)                 # kill -inf at invalid positions
    o_ref[...] = _bn_rows(y, count, mask)


def _avg_pool_bn_kernel(x_ref, inv_ref, mask_ref, o_ref, *, offsets, width, count):
    x = x_ref[...]
    s = x
    for off in offsets:
        if off:
            s = s + pltpu.roll(x, shift=width - off, axis=1)
    y = s * inv_ref[...]                            # count_include_pad=False map
    mask = mask_ref[...]
    o_ref[...] = _bn_rows(jnp.where(mask > 0, y, 0.0), count, mask)


def _gap_linear_kernel(x_ref, w_ref, b_ref, o_ref):
    pooled = jnp.mean(x_ref[...], axis=2)            # (N, C)
    o_ref[...] = jnp.dot(pooled, w_ref[...],
                         preferred_element_type=jnp.float32) + b_ref[...]


# ------------------------------ call wrappers --------------------------------

def matmul_bn(w2, x2, relu, bn):
    """w2:(Cout,K) x2:(K,M) -> (Cout,M) f32 with optional ReLU-in / BN-out."""
    Cout, K = w2.shape
    M = x2.shape[1]
    kern = functools.partial(_matmul_bn_kernel, relu=relu, bn=bn, count=float(M))
    return pl.pallas_call(
        kern,
        out_shape=jax.ShapeDtypeStruct((Cout, M), jnp.float32),
        grid=(1,),
        in_specs=[pl.BlockSpec((Cout, K), lambda i: (0, 0)),
                  pl.BlockSpec((K, M), lambda i: (0, 0))],
        out_specs=pl.BlockSpec((Cout, M), lambda i: (0, 0)),
        compiler_params=_COMPILER_PARAMS,
    )(w2.astype(jnp.bfloat16), x2.astype(jnp.bfloat16))


def gap_linear(x3, w, b):
    """AdaptiveAvgPool2d(1) + Linear fused.  x3: (N, C, H*W) f32."""
    N, C, HW = x3.shape
    num_classes = w.shape[0]
    wt = w.T.astype(jnp.float32)
    b2 = b.reshape(1, num_classes).astype(jnp.float32)
    return pl.pallas_call(
        _gap_linear_kernel,
        out_shape=jax.ShapeDtypeStruct((N, num_classes), jnp.float32),
        grid=(1,),
        in_specs=[pl.BlockSpec((N, C, HW), lambda i: (0, 0, 0)),
                  pl.BlockSpec((C, num_classes), lambda i: (0, 0)),
                  pl.BlockSpec((1, num_classes), lambda i: (0, 0))],
        out_specs=pl.BlockSpec((N, num_classes), lambda i: (0, 0)),
        compiler_params=_COMPILER_PARAMS,
    )(x3.astype(jnp.float32), wt, b2)


# ------------------------- padded-frame bookkeeping --------------------------

def _round_up(x, m):
    return (x + m - 1) // m * m


def _frame_geom(N, H, W, k, stride, pad, dilation):
    Hp, Wp = H + 2 * pad, W + 2 * pad
    Hout = (H + 2 * pad - dilation * (k - 1) - 1) // stride + 1
    Wout = (W + 2 * pad - dilation * (k - 1) - 1) // stride + 1
    Mp = N * Hp * Wp
    Mpad = max(_round_up(Mp, 128), 128)
    offs = tuple(i * dilation * Wp + j * dilation for i in range(k) for j in range(k))
    return Hp, Wp, Hout, Wout, Mp, Mpad, offs


def _valid_mask_np(N, Hp, Wp, Hout, Wout, stride, Mpad):
    m = np.zeros((N, Hp, Wp), np.float32)
    m[:, 0:stride * (Hout - 1) + 1:stride, 0:stride * (Wout - 1) + 1:stride] = 1.0
    out = np.zeros((1, Mpad), np.float32)
    out[0, :m.size] = m.reshape(-1)
    return out


def _to_frame(x_cm, pad, Mpad, pad_value=0.0):
    """(C, N, H, W) -> zero(/value)-padded lane-dense frame (C, Mpad)."""
    C = x_cm.shape[0]
    xp = jnp.pad(x_cm, ((0, 0), (0, 0), (pad, pad), (pad, pad)),
                 constant_values=pad_value)
    flat = xp.reshape(C, -1)
    extra = Mpad - flat.shape[1]
    if extra:
        flat = jnp.pad(flat, ((0, 0), (0, extra)))
    return flat


def _from_frame(y, N, Hp, Wp, Hout, Wout, stride, Mp):
    """(C, Mpad) kernel output -> (C, N, Hout, Wout) valid block."""
    C = y.shape[0]
    img = y[:, :Mp].reshape(C, N, Hp, Wp)
    return img[:, :, 0:stride * (Hout - 1) + 1:stride,
               0:stride * (Wout - 1) + 1:stride]


# ------------------------------- fused ops -----------------------------------

def conv_bn_1x1(x_cm, w, relu, bn):
    """[ReLU ->] 1x1 Conv(bias=False) [-> BN] in one call, channel-major."""
    C, N, H, W = x_cm.shape
    Cout = w.shape[0]
    y = matmul_bn(w.reshape(Cout, C), x_cm.reshape(C, N * H * W), relu, bn)
    return y.reshape(Cout, N, H, W)


def stem_conv_bn(x_cm, w):
    """Conv3x3(pad=1, bias=False) + BN.  Cin is tiny, host im2col is fine here."""
    Cin, N, H, W = x_cm.shape
    Cout = w.shape[0]
    k, pad = 3, 1
    xp = jnp.pad(x_cm, ((0, 0), (0, 0), (pad, pad), (pad, pad)))
    cols = jnp.stack([xp[:, :, i:i + H, j:j + W]
                      for i in range(k) for j in range(k)], axis=1)
    x2 = cols.reshape(Cin * k * k, N * H * W)
    y = matmul_bn(w.reshape(Cout, Cin * k * k), x2, relu=False, bn=True)
    return y.reshape(Cout, N, H, W)


def factorized_reduce(x_cm, w1, w2):
    """ReLU -> two stride-2 1x1 convs -> concat -> BN (BN fused per half)."""
    C, N, H, W = x_cm.shape
    xa = x_cm[:, :, ::2, ::2]
    xb = x_cm[:, :, 1::2, 1::2]
    H2, W2 = xa.shape[2], xa.shape[3]
    M2 = N * H2 * W2
    Ch = w1.shape[0]
    ya = matmul_bn(w1.reshape(Ch, C), xa.reshape(C, M2), relu=True, bn=True)
    yb = matmul_bn(w2.reshape(Ch, C), xb.reshape(C, M2), relu=True, bn=True)
    return jnp.concatenate([ya, yb], axis=0).reshape(2 * Ch, N, H2, W2)


def dw_pw_bn(x_cm, dw_w, pw_w, stride, pad, dilation=1, relu=True):
    """ReLU -> depthwise -> pointwise 1x1 -> BN, one pallas_call (padded frame)."""
    C, N, H, W = x_cm.shape
    k = dw_w.shape[2]
    Hp, Wp, Hout, Wout, Mp, Mpad, offs = _frame_geom(N, H, W, k, stride, pad, dilation)
    mask = jnp.asarray(_valid_mask_np(N, Hp, Wp, Hout, Wout, stride, Mpad))
    count = float(N * Hout * Wout)
    Cout = pw_w.shape[0]
    xf = _to_frame(x_cm, pad, Mpad).astype(jnp.bfloat16)
    dw2 = dw_w.reshape(C, k * k).astype(jnp.float32)
    pw2 = pw_w.reshape(Cout, C).astype(jnp.bfloat16)
    kern = functools.partial(_dw_pw_bn_kernel, relu=relu, offsets=offs,
                             width=Mpad, count=count)
    y = pl.pallas_call(
        kern,
        out_shape=jax.ShapeDtypeStruct((Cout, Mpad), jnp.float32),
        grid=(1,),
        in_specs=[pl.BlockSpec((C, Mpad), lambda i: (0, 0)),
                  pl.BlockSpec((C, k * k), lambda i: (0, 0)),
                  pl.BlockSpec((Cout, C), lambda i: (0, 0)),
                  pl.BlockSpec((1, Mpad), lambda i: (0, 0))],
        out_specs=pl.BlockSpec((Cout, Mpad), lambda i: (0, 0)),
        compiler_params=_COMPILER_PARAMS,
    )(xf, dw2, pw2, mask)
    return _from_frame(y, N, Hp, Wp, Hout, Wout, stride, Mp)


def _sep_conv_fused(x_cm, p, pad):
    """Stride-1 SepConv: both dw->pw->BN stages fused into one pallas_call."""
    C, N, H, W = x_cm.shape
    k = p['dw1'].shape[2]
    Hp, Wp, Hout, Wout, Mp, Mpad, offs = _frame_geom(N, H, W, k, 1, pad, 1)
    assert Hout == H and Wout == W          # 'same' conv -> stages share the frame
    mask = jnp.asarray(_valid_mask_np(N, Hp, Wp, Hout, Wout, 1, Mpad))
    count = float(N * H * W)
    off0 = pad * Wp + pad
    xf = _to_frame(x_cm, pad, Mpad).astype(jnp.bfloat16)
    dw1 = p['dw1'].reshape(C, k * k).astype(jnp.float32)
    dw2 = p['dw2'].reshape(C, k * k).astype(jnp.float32)
    pw1 = p['pw1'].reshape(C, C).astype(jnp.bfloat16)
    pw2 = p['pw2'].reshape(C, C).astype(jnp.bfloat16)
    kern = functools.partial(_sep2_bn_kernel, offsets=offs, width=Mpad,
                             count=count, off0=off0)
    y = pl.pallas_call(
        kern,
        out_shape=jax.ShapeDtypeStruct((C, Mpad), jnp.float32),
        grid=(1,),
        in_specs=[pl.BlockSpec((C, Mpad), lambda i: (0, 0)),
                  pl.BlockSpec((C, k * k), lambda i: (0, 0)),
                  pl.BlockSpec((C, C), lambda i: (0, 0)),
                  pl.BlockSpec((C, k * k), lambda i: (0, 0)),
                  pl.BlockSpec((C, C), lambda i: (0, 0)),
                  pl.BlockSpec((1, Mpad), lambda i: (0, 0))],
        out_specs=pl.BlockSpec((C, Mpad), lambda i: (0, 0)),
        compiler_params=_COMPILER_PARAMS,
    )(xf, dw1, pw1, dw2, pw2, mask)
    return _from_frame(y, N, Hp, Wp, Hout, Wout, 1, Mp)


def sep_conv(x_cm, p, stride, pad):
    if stride == 1:
        return _sep_conv_fused(x_cm, p, pad)
    # stride-2 stage-1 output lands on a strided sub-grid; re-framing it inside a
    # single kernel would need a lane gather, so the reduction edges use two calls.
    y = dw_pw_bn(x_cm, p['dw1'], p['pw1'], stride, pad, 1, relu=True)
    return dw_pw_bn(y, p['dw2'], p['pw2'], 1, pad, 1, relu=True)


def pool_bn(x_cm, kind, stride):
    """3x3 pool (pad=1) + BN fused; taps formed in-kernel from the padded frame."""
    C, N, H, W = x_cm.shape
    k, pad = 3, 1
    Hp, Wp, Hout, Wout, Mp, Mpad, offs = _frame_geom(N, H, W, k, stride, pad, 1)
    mask = jnp.asarray(_valid_mask_np(N, Hp, Wp, Hout, Wout, stride, Mpad))
    count = float(N * Hout * Wout)
    if kind == 'max':
        xf = _to_frame(x_cm.astype(jnp.float32), pad, Mpad, pad_value=-jnp.inf)
        kern = functools.partial(_max_pool_bn_kernel, offsets=offs,
                                 width=Mpad, count=count)
        y = pl.pallas_call(
            kern,
            out_shape=jax.ShapeDtypeStruct((C, Mpad), jnp.float32),
            grid=(1,),
            in_specs=[pl.BlockSpec((C, Mpad), lambda i: (0, 0)),
                      pl.BlockSpec((1, Mpad), lambda i: (0, 0))],
            out_specs=pl.BlockSpec((C, Mpad), lambda i: (0, 0)),
            compiler_params=_COMPILER_PARAMS,
        )(xf, mask)
    else:
        # static reciprocal window-count map (count_include_pad=False)
        ones = np.pad(np.ones((H, W), np.float32), pad)
        cnt = np.zeros((Hout, Wout), np.float32)
        for i in range(k):
            for j in range(k):
                cnt += ones[i:i + stride * (Hout - 1) + 1:stride,
                            j:j + stride * (Wout - 1) + 1:stride]
        inv_np = np.zeros((N, Hp, Wp), np.float32)
        inv_np[:, 0:stride * (Hout - 1) + 1:stride,
               0:stride * (Wout - 1) + 1:stride] = (1.0 / cnt)[None]
        inv = np.zeros((1, Mpad), np.float32)
        inv[0, :inv_np.size] = inv_np.reshape(-1)
        inv = jnp.asarray(inv)
        xf = _to_frame(x_cm.astype(jnp.float32), pad, Mpad, pad_value=0.0)
        kern = functools.partial(_avg_pool_bn_kernel, offsets=offs,
                                 width=Mpad, count=count)
        y = pl.pallas_call(
            kern,
            out_shape=jax.ShapeDtypeStruct((C, Mpad), jnp.float32),
            grid=(1,),
            in_specs=[pl.BlockSpec((C, Mpad), lambda i: (0, 0)),
                      pl.BlockSpec((1, Mpad), lambda i: (0, 0)),
                      pl.BlockSpec((1, Mpad), lambda i: (0, 0))],
            out_specs=pl.BlockSpec((C, Mpad), lambda i: (0, 0)),
            compiler_params=_COMPILER_PARAMS,
        )(xf, inv, mask)
    return _from_frame(y, N, Hp, Wp, Hout, Wout, stride, Mp)


# ----------------------------- DARTS-style ops --------------------------------

def zero_op(x_cm, stride):
    if stride == 1:
        return jnp.zeros_like(x_cm)
    return jnp.zeros_like(x_cm[:, :, ::stride, ::stride])


def apply_op(x_cm, op_params, prim, stride):
    if prim == 'none':
        return zero_op(x_cm, stride)
    if prim == 'max_pool_3x3':
        return pool_bn(x_cm, 'max', stride)
    if prim == 'avg_pool_3x3':
        return pool_bn(x_cm, 'avg', stride)
    if prim == 'skip_connect':
        if stride == 1:
            return x_cm
        return factorized_reduce(x_cm, op_params['w1'], op_params['w2'])
    if prim.startswith('sep_conv'):
        k = 3 if '3x3' in prim else 5
        return sep_conv(x_cm, op_params, stride, k // 2)
    if prim.startswith('dil_conv'):
        k = 3 if '3x3' in prim else 5
        pad = 2 if k == 3 else 4
        return dw_pw_bn(x_cm, op_params['dw'], op_params['pw'], stride, pad, 2,
                        relu=True)
    raise ValueError(prim)


def mixed_op_forward(x_nchw, per_op_params, selected_op, stride):
    """PyTorch MixedOp.forward(x, selected_op): run the selected primitive."""
    prim = PAR_PRIMITIVES[selected_op]
    x_cm = jnp.transpose(x_nchw, (1, 0, 2, 3))
    y = apply_op(x_cm, per_op_params[selected_op], prim, stride)
    return jnp.transpose(y, (1, 0, 2, 3))


# --------------------------------- cells --------------------------------------

def cell_forward(s0, s1, p, sel, steps, multiplier, reduction):
    if 'w1' in p['pre0']:            # FactorizedReduce preprocess (reduction_prev)
        s0 = factorized_reduce(s0, p['pre0']['w1'], p['pre0']['w2'])
    else:                            # ReLUConvBN 1x1
        s0 = conv_bn_1x1(s0, p['pre0']['w'], relu=True, bn=True)
    s1 = conv_bn_1x1(s1, p['pre1']['w'], relu=True, bn=True)
    states = [s0, s1]
    offset = 0
    for i in range(steps):
        s = None
        for j, h in enumerate(states):
            stride = 2 if (reduction and j < 2) else 1
            op_idx = sel[offset + j]
            y = apply_op(h, p['ops'][offset + j][op_idx],
                         PAR_PRIMITIVES[op_idx], stride)
            s = y if s is None else s + y
        offset += len(states)
        states.append(s)
    return jnp.concatenate(states[-multiplier:], axis=0)   # channel axis == 0


def network_forward(params, x_nchw, reductions, selected_ops, steps, multiplier):
    x_cm = jnp.transpose(x_nchw, (1, 0, 2, 3))   # the ONLY input-side relayout
    s0 = s1 = stem_conv_bn(x_cm, params['stem']['w'])
    for cell_p, reduction in zip(params['cells'], reductions):
        sel = selected_ops['reduce' if reduction else 'normal']
        s0, s1 = s1, cell_forward(s0, s1, cell_p, sel, steps, multiplier, reduction)
    C, N, H, W = s1.shape
    x3 = jnp.transpose(s1, (1, 0, 2, 3)).reshape(N, C, H * W)   # head-side relayout
    return gap_linear(x3, params['classifier']['w'], params['classifier']['b'])


# ------------------------ deterministic parameter init ------------------------

class KeyGen:
    def __init__(self, seed):
        self._key = jax.random.PRNGKey(seed)

    def next(self):
        self._key, sub = jax.random.split(self._key)
        return sub


def _winit(kg, shape, scale=0.1):
    return scale * jax.random.normal(kg.next(), shape, dtype=jnp.float32)


def make_op_params(kg, C, stride, prim):
    if prim == 'skip_connect' and stride == 2:
        return {'w1': _winit(kg, (C // 2, C, 1, 1)), 'w2': _winit(kg, (C // 2, C, 1, 1))}
    if prim.startswith('sep_conv'):
        k = 3 if '3x3' in prim else 5
        return {'dw1': _winit(kg, (C, 1, k, k)), 'pw1': _winit(kg, (C, C, 1, 1)),
                'dw2': _winit(kg, (C, 1, k, k)), 'pw2': _winit(kg, (C, C, 1, 1))}
    if prim.startswith('dil_conv'):
        k = 3 if '3x3' in prim else 5
        return {'dw': _winit(kg, (C, 1, k, k)), 'pw': _winit(kg, (C, C, 1, 1))}
    return {}   # none / pools / identity skip (BNs are affine=False -> no params)


def make_cell_params(kg, C_pp, C_p, C, reduction, reduction_prev, steps):
    p = {}
    if reduction_prev:
        p['pre0'] = {'w1': _winit(kg, (C // 2, C_pp, 1, 1)),
                     'w2': _winit(kg, (C // 2, C_pp, 1, 1))}
    else:
        p['pre0'] = {'w': _winit(kg, (C, C_pp, 1, 1))}
    p['pre1'] = {'w': _winit(kg, (C, C_p, 1, 1))}
    ops = []
    for i in range(steps):
        for j in range(2 + i):
            stride = 2 if (reduction and j < 2) else 1
            ops.append([make_op_params(kg, C, stride, prim) for prim in PAR_PRIMITIVES])
    p['ops'] = ops
    return p


def make_network_params(seed, input_c, C, num_classes, layers, steps, multiplier):
    kg = KeyGen(seed)
    params = {}
    C_curr = 1 * C   # stem_multiplier is forced to 1 inside BasicNetwork.__init__
    params['stem'] = {'w': _winit(kg, (C_curr, input_c, 3, 3))}
    C_pp, C_p, C_curr = C_curr, C_curr, C
    cells, reductions = [], []
    reduction_prev = False
    for i in range(layers):
        reduction = i in [layers // 3, 2 * layers // 3]
        cells.append(make_cell_params(kg, C_pp, C_p, C_curr, reduction,
                                      reduction_prev, steps))
        reductions.append(reduction)
        reduction_prev = reduction
        C_pp, C_p = C_p, multiplier * C_curr
    params['cells'] = cells
    params['classifier'] = {'w': _winit(kg, (num_classes, C_p)),
                            'b': jnp.zeros((num_classes,), jnp.float32)}
    return params, reductions


# ------------------- pure-JAX references for self-checks ----------------------

def _ref_bn(y):
    m = y.mean(axis=(0, 2, 3), keepdims=True)
    v = ((y - m) ** 2).mean(axis=(0, 2, 3), keepdims=True)
    return (y - m) * jax.lax.rsqrt(v + _BN_EPS)


def _ref_dw_pw_bn(x, dw, pw, stride, pad, dilation):
    dn = ('NCHW', 'OIHW', 'NCHW')
    x = jnp.maximum(x, 0.0)
    y = jax.lax.conv_general_dilated(
        x, dw, (stride, stride), [(pad, pad), (pad, pad)],
        rhs_dilation=(dilation, dilation), dimension_numbers=dn,
        feature_group_count=x.shape[1])
    y = jax.lax.conv_general_dilated(y, pw, (1, 1), [(0, 0), (0, 0)],
                                     dimension_numbers=dn)
    return _ref_bn(y)


def _ref_max_pool_bn(x, stride):
    y = jax.lax.reduce_window(x, -jnp.inf, jax.lax.max, (1, 1, 3, 3),
                              (1, 1, stride, stride),
                              [(0, 0), (0, 0), (1, 1), (1, 1)])
    return _ref_bn(y)


# ----------------------------------- main --------------------------------------

if __name__ == "__main__":
    input_c, C, num_classes, layers = 3, 4, 10, 3
    steps, multiplier = 4, 4
    N, H, W = 2, 8, 8

    # ---- spot-check the fused Pallas ops against pure-JAX references ----
    kg = KeyGen(7)
    Cc = 8
    xs = jax.random.normal(kg.next(), (N, Cc, H, W), jnp.float32)
    xs_cm = jnp.transpose(xs, (1, 0, 2, 3))

    dil = {'dw': _winit(kg, (Cc, 1, 3, 3)), 'pw': _winit(kg, (Cc, Cc, 1, 1))}
    got = jnp.transpose(dw_pw_bn(xs_cm, dil['dw'], dil['pw'], 1, 2, 2, relu=True),
                        (1, 0, 2, 3))
    want = _ref_dw_pw_bn(xs, dil['dw'], dil['pw'], 1, 2, 2)
    np.testing.assert_allclose(np.asarray(got), np.asarray(want), atol=8e-2, rtol=8e-2)

    sep = {'dw1': _winit(kg, (Cc, 1, 3, 3)), 'pw1': _winit(kg, (Cc, Cc, 1, 1)),
           'dw2': _winit(kg, (Cc, 1, 3, 3)), 'pw2': _winit(kg, (Cc, Cc, 1, 1))}
    got = jnp.transpose(sep_conv(xs_cm, sep, 1, 1), (1, 0, 2, 3))
    want = _ref_dw_pw_bn(_ref_dw_pw_bn(xs, sep['dw1'], sep['pw1'], 1, 1, 1),
                         sep['dw2'], sep['pw2'], 1, 1, 1)
    np.testing.assert_allclose(np.asarray(got), np.asarray(want), atol=1.5e-1, rtol=1e-1)

    got = jnp.transpose(pool_bn(xs_cm, 'max', 2), (1, 0, 2, 3))
    want = _ref_max_pool_bn(xs, 2)
    np.testing.assert_allclose(np.asarray(got), np.asarray(want), atol=1e-2, rtol=1e-2)

    # ---- MixedOp itself (the module in the spec), every primitive ----
    mixed_params = [make_op_params(KeyGen(11 + i), Cc, 1, prim)
                    for i, prim in enumerate(PAR_PRIMITIVES)]
    for sel_idx in range(len(PAR_PRIMITIVES)):
        y = mixed_op_forward(xs, mixed_params, sel_idx, stride=1)
        jax.block_until_ready(y)
        assert bool(jnp.all(jnp.isfinite(y)))

    # ---- full DARTS-style network built from MixedOps ----
    params, reductions = make_network_params(42, input_c, C, num_classes,
                                             layers, steps, multiplier)
    num_edges = sum(2 + i for i in range(steps))   # 14
    num_ops = len(PAR_PRIMITIVES)
    selected_ops = {
        'normal': [i % num_ops for i in range(num_edges)],
        'reduce': [(3 * i + 1) % num_ops for i in range(num_edges)],
    }
    x = jax.random.normal(jax.random.PRNGKey(0), (N, input_c, H, W), jnp.float32)

    fwd = jax.jit(lambda p, xx: network_forward(p, xx, reductions, selected_ops,
                                                steps, multiplier))
    logits = fwd(params, x)
    jax.block_until_ready(logits)
    assert logits.shape == (N, num_classes)
    assert bool(jnp.all(jnp.isfinite(logits)))

    print("KERNEL_OK")
</pallas_src>

<mosaic_0001>
module attributes {stable_mosaic.version = 11 : i64} {
  func.func @_dw_pw_bn_kernel(%arg0: i32, %arg1: memref<8x384xbf16, #tpu.memory_space<vmem>>, %arg2: memref<8x9xf32, #tpu.memory_space<vmem>>, %arg3: memref<8x8xbf16, #tpu.memory_space<vmem>>, %arg4: memref<1x384xf32, #tpu.memory_space<vmem>>, %arg5: memref<8x384xf32, #tpu.memory_space<vmem>>) attributes {dimension_semantics = [#tpu.dimension_semantics<arbitrary>], iteration_bounds = array<i64: 1>, scalar_prefetch = 0 : i64, scratch_operands = 0 : i64, tpu.core_type = #tpu.core_type<tc>, window_params = [{pipeline_mode = #tpu.pipeline_mode<synchronous>, transform_indices = @transform_0, window_bounds = array<i64: 8, 384>}, {pipeline_mode = #tpu.pipeline_mode<synchronous>, transform_indices = @transform_1, window_bounds = array<i64: 8, 9>}, {pipeline_mode = #tpu.pipeline_mode<synchronous>, transform_indices = @transform_2, window_bounds = array<i64: 8, 8>}, {pipeline_mode = #tpu.pipeline_mode<synchronous>, transform_indices = @transform_3, window_bounds = array<i64: 1, 384>}, {pipeline_mode = #tpu.pipeline_mode<synchronous>, transform_indices = @transform_4, window_bounds = array<i64: 8, 384>}]} {
    %c0 = arith.constant 0 : index
    %c0_0 = arith.constant 0 : index
    %0 = vector.load %arg1[%c0, %c0_0] : memref<8x384xbf16, #tpu.memory_space<vmem>>, vector<8x384xbf16>
    %1 = arith.extf %0 : vector<8x384xbf16> to vector<8x384xf32>
    %cst = arith.constant 0.000000e+00 : f32
    %2 = vector.broadcast %cst : f32 to vector<8x384xf32>
    %3 = arith.maximumf %1, %2 : vector<8x384xf32>
    %c0_1 = arith.constant 0 : index
    %c0_2 = arith.constant 0 : index
    %4 = vector.load %arg2[%c0_1, %c0_2] : memref<8x9xf32, #tpu.memory_space<vmem>>, vector<8x9xf32>
    %5 = vector.extract_strided_slice %4 {offsets = [0, 0], sizes = [8, 1], strides = [1, 1]} : vector<8x9xf32> to vector<8x1xf32>
    %6 = vector.broadcast %5 : vector<8x1xf32> to vector<8x384xf32>
    %7 = arith.mulf %3, %6 : vector<8x384xf32>
    %c382_i32 = arith.constant 382 : i32
    %8 = tpu.dynamic_rotate %3 by %c382_i32 dim 1 : vector<8x384xf32>, i32 -> vector<8x384xf32>
    %9 = vector.extract_strided_slice %4 {offsets = [0, 1], sizes = [8, 1], strides = [1, 1]} : vector<8x9xf32> to vector<8x1xf32>
    %10 = vector.broadcast %9 : vector<8x1xf32> to vector<8x384xf32>
    %11 = arith.mulf %8, %10 : vector<8x384xf32>
    %12 = arith.addf %7, %11 : vector<8x384xf32>
    %c380_i32 = arith.constant 380 : i32
    %13 = tpu.dynamic_rotate %3 by %c380_i32 dim 1 : vector<8x384xf32>, i32 -> vector<8x384xf32>
    %14 = vector.extract_strided_slice %4 {offsets = [0, 2], sizes = [8, 1], strides = [1, 1]} : vector<8x9xf32> to vector<8x1xf32>
    %15 = vector.broadcast %14 : vector<8x1xf32> to vector<8x384xf32>
    %16 = arith.mulf %13, %15 : vector<8x384xf32>
    %17 = arith.addf %12, %16 : vector<8x384xf32>
    %c360_i32 = arith.constant 360 : i32
    %18 = tpu.dynamic_rotate %3 by %c360_i32 dim 1 : vector<8x384xf32>, i32 -> vector<8x384xf32>
    %19 = vector.extract_strided_slice %4 {offsets = [0, 3], sizes = [8, 1], strides = [1, 1]} : vector<8x9xf32> to vector<8x1xf32>
    %20 = vector.broadcast %19 : vector<8x1xf32> to vector<8x384xf32>
    %21 = arith.mulf %18, %20 : vector<8x384xf32>
    %22 = arith.addf %17, %21 : vector<8x384xf32>
    %c358_i32 = arith.constant 358 : i32
    %23 = tpu.dynamic_rotate %3 by %c358_i32 dim 1 : vector<8x384xf32>, i32 -> vector<8x384xf32>
    %24 = vector.extract_strided_slice %4 {offsets = [0, 4], sizes = [8, 1], strides = [1, 1]} : vector<8x9xf32> to vector<8x1xf32>
    %25 = vector.broadcast %24 : vector<8x1xf32> to vector<8x384xf32>
    %26 = arith.mulf %23, %25 : vector<8x384xf32>
    %27 = arith.addf %22, %26 : vector<8x384xf32>
    %c356_i32 = arith.constant 356 : i32
    %28 = tpu.dynamic_rotate %3 by %c356_i32 dim 1 : vector<8x384xf32>, i32 -> vector<8x384xf32>
    %29 = vector.extract_strided_slice %4 {offsets = [0, 5], sizes = [8, 1], strides = [1, 1]} : vector<8x9xf32> to vector<8x1xf32>
    %30 = vector.broadcast %29 : vector<8x1xf32> to vector<8x384xf32>
    %31 = arith.mulf %28, %30 : vector<8x384xf32>
    %32 = arith.addf %27, %31 : vector<8x384xf32>
    %c336_i32 = arith.constant 336 : i32
    %33 = tpu.dynamic_rotate %3 by %c336_i32 dim 1 : vector<8x384xf32>, i32 -> vector<8x384xf32>
    %34 = vector.extract_strided_slice %4 {offsets = [0, 6], sizes = [8, 1], strides = [1, 1]} : vector<8x9xf32> to vector<8x1xf32>
    %35 = vector.broadcast %34 : vector<8x1xf32> to vector<8x384xf32>
    %36 = arith.mulf %33, %35 : vector<8x384xf32>
    %37 = arith.addf %32, %36 : vector<8x384xf32>
    %c334_i32 = arith.constant 334 : i32
    %38 = tpu.dynamic_rotate %3 by %c334_i32 dim 1 : vector<8x384xf32>, i32 -> vector<8x384xf32>
    %39 = vector.extract_strided_slice %4 {offsets = [0, 7], sizes = [8, 1], strides = [1, 1]} : vector<8x9xf32> to vector<8x1xf32>
    %40 = vector.broadcast %39 : vector<8x1xf32> to vector<8x384xf32>
    %41 = arith.mulf %38, %40 : vector<8x384xf32>
    %42 = arith.addf %37, %41 : vector<8x384xf32>
    %c332_i32 = arith.constant 332 : i32
    %43 = tpu.dynamic_rotate %3 by %c332_i32 dim 1 : vector<8x384xf32>, i32 -> vector<8x384xf32>
    %44 = vector.extract_strided_slice %4 {offsets = [0, 8], sizes = [8, 1], strides = [1, 1]} : vector<8x9xf32> to vector<8x1xf32>
    %45 = vector.broadcast %44 : vector<8x1xf32> to vector<8x384xf32>
    %46 = arith.mulf %43, %45 : vector<8x384xf32>
    %47 = arith.addf %42, %46 : vector<8x384xf32>
    %c0_3 = arith.constant 0 : index
    %c0_4 = arith.constant 0 : index
    %48 = vector.load %arg3[%c0_3, %c0_4] : memref<8x8xbf16, #tpu.memory_space<vmem>>, vector<8x8xbf16>
    %49 = arith.truncf %47 : vector<8x384xf32> to vector<8x384xbf16>
    %cst_5 = arith.constant dense<0.000000e+00> : vector<8x384xf32>
    %50 = tpu.matmul %48, %49, %cst_5 {dimension_numbers = #tpu.dot_dimension_numbers<[1], [0], [0], [1], [0, 0, 1, 1], [], []>} : vector<8x8xbf16>, vector<8x384xbf16>, vector<8x384xf32> -> vector<8x384xf32>
    %c0_6 = arith.constant 0 : index
    %c0_7 = arith.constant 0 : index
    %51 = vector.load %arg4[%c0_6, %c0_7] : memref<1x384xf32, #tpu.memory_space<vmem>>, vector<1x384xf32>
    %52 = vector.broadcast %51 : vector<1x384xf32> to vector<8x384xf32>
    %53 = arith.mulf %50, %52 : vector<8x384xf32>
    %cst_8 = arith.constant dense<0.000000e+00> : vector<8xf32>
    %54 = vector.multi_reduction <add>, %53, %cst_8 [1] : vector<8x384xf32> to vector<8xf32>
    %55 = vector.shape_cast %54 : vector<8xf32> to vector<8x1xf32>
    %cst_9 = arith.constant 7.812500e-03 : f32
    %56 = vector.broadcast %cst_9 : f32 to vector<8x1xf32>
    %57 = arith.mulf %55, %56 : vector<8x1xf32>
    %58 = vector.broadcast %57 : vector<8x1xf32> to vector<8x384xf32>
    %59 = arith.subf %53, %58 : vector<8x384xf32>
    %60 = vector.broadcast %51 : vector<1x384xf32> to vector<8x384xf32>
    %61 = arith.mulf %59, %60 : vector<8x384xf32>
    %62 = arith.mulf %61, %61 : vector<8x384xf32>
    %cst_10 = arith.constant dense<0.000000e+00> : vector<8xf32>
    %63 = vector.multi_reduction <add>, %62, %cst_10 [1] : vector<8x384xf32> to vector<8xf32>
    %64 = vector.shape_cast %63 : vector<8xf32> to vector<8x1xf32>
    %cst_11 = arith.constant 7.812500e-03 : f32
    %65 = vector.broadcast %cst_11 : f32 to vector<8x1xf32>
    %66 = arith.mulf %64, %65 : vector<8x1xf32>
    %cst_12 = arith.constant 9.99999974E-6 : f32
    %67 = vector.broadcast %cst_12 : f32 to vector<8x1xf32>
    %68 = arith.addf %66, %67 : vector<8x1xf32>
    %69 = math.rsqrt %68 : vector<8x1xf32>
    %70 = vector.broadcast %69 : vector<8x1xf32> to vector<8x384xf32>
    %71 = arith.mulf %61, %70 : vector<8x384xf32>
    %c0_13 = arith.constant 0 : index
    %c0_14 = arith.constant 0 : index
    %72 = vector.load %arg5[%c0_13, %c0_14] : memref<8x384xf32, #tpu.memory_space<vmem>>, vector<8x384xf32>
    tpu.vector_store %arg5[%c0_13, %c0_14], %71 {strides = array<i32>} : memref<8x384xf32, #tpu.memory_space<vmem>>, vector<8x384xf32>,
    return
  }
  func.func @transform_0(%arg0: i32) -> (i32, i32) {
    %c0_i32 = arith.constant 0 : i32
    %c0_i32_0 = arith.constant 0 : i32
    %c0_i32_1 = arith.constant 0 : i32
    return %c0_i32, %c0_i32_0 : i32, i32
  }
  func.func @transform_1(%arg0: i32) -> (i32, i32) {
    %c0_i32 = arith.constant 0 : i32
    %c0_i32_0 = arith.constant 0 : i32
    %c0_i32_1 = arith.constant 0 : i32
    return %c0_i32, %c0_i32_0 : i32, i32
  }
  func.func @transform_2(%arg0: i32) -> (i32, i32) {
    %c0_i32 = arith.constant 0 : i32
    %c0_i32_0 = arith.constant 0 : i32
    %c0_i32_1 = arith.constant 0 : i32
    return %c0_i32, %c0_i32_0 : i32, i32
  }
  func.func @transform_3(%arg0: i32) -> (i32, i32) {
    %c0_i32 = arith.constant 0 : i32
    %c0_i32_0 = arith.constant 0 : i32
    %c0_i32_1 = arith.constant 0 : i32
    return %c0_i32, %c0_i32_0 : i32, i32
  }
  func.func @transform_4(%arg0: i32) -> (i32, i32) {
    %c0_i32 = arith.constant 0 : i32
    %c0_i32_0 = arith.constant 0 : i32
    %c0_i32_1 = arith.constant 0 : i32
    return %c0_i32, %c0_i32_0 : i32, i32
  }
}

</mosaic_0001>

<bundles_post_ra>
// kernel: tpu_custom_call.1
= control target key start
LH: loop header
LB: loop body
LE: loop exit
PB: predicated region body
PF: predicated region fallthrough
CT: control target
= control target key end

     0   :  { %9 = vsyncpa [#allocation3], 0  ;;  %s730_s0 = inlined_call_operand.hbm [shape: bf16[8,384], index: 0, kind: input, shape index: {}]   ;;  %s731_s1 = inlined_call_operand.hbm [shape: f32[8,9], index: 1, kind: input, shape index: {}]   ;;  %s732_s2 = inlined_call_operand.hbm [shape: bf16[8,8], index: 2, kind: input, shape index: {}]   ;;  %s733_s3 = inlined_call_operand.vmem [shape: f32[1,384], index: 3, kind: input, shape index: {}]   ;;  %s734_s4 = inlined_call_operand.hbm [shape: f32[8,384], index: 4, kind: output, shape index: {}]  }
   0x1   :  { %10 = vsyncpa [#allocation6], 0 }
   0x2   :  { %11 = vsyncpa [#allocation4], 0  ;;  %s566_s15 = smov [#allocation5]   ;;  %s567_s17 = smov [#allocation2]  }
   0x3   :  { %s28_s16 = sshll.u32 %s566_s15, 4  ;;  %s18_s18 = sshll.u32 %s567_s17, 4  ;;  %s29_s16 = int_to_ptr.vmem [resolvable:$true] %s28_s16  ;;  %s19_s18 = int_to_ptr.vmem [resolvable:$true] %s18_s18 }
   0x4   :  { %s488_s19 = scalar_lea.vmem %s29_s16, 128  ;;  %p493_p1 = scmp.lt.s32.totalorder %s29_s16, %s29_s16 }
   0x5   :  { %p489_p0 = scmp.ne.s32.totalorder %s29_s16, %s488_s19  ;;  %p494_p2 = scmp.lt.s32.totalorder %s488_s19, %s488_s19 }
   0x7   :  { %p495_p3 = por %p494_p2, %p493_p1 }
   0x9   :  { %p496_p4 = pnand %p495_p3, %p489_p0 }
   0xb   :  { %499 = shalt.err (!%p496_p4)
}
   0xc   :  { %31 = dma.hbm_to_vmem [thread:$0]  %s731_s1, 128, %s29_s16, [#allocation6]  }
   0xd   :  { %s508_s22 = scalar_lea.vmem %s19_s18, 192  ;;  %p513_p6 = scmp.lt.s32.totalorder %s19_s18, %s19_s18 }
   0xe   :  { %p509_p5 = scmp.ne.s32.totalorder %s19_s18, %s508_s22  ;;  %p514_p7 = scmp.lt.s32.totalorder %s508_s22, %s508_s22 }
  0x10   :  { %p515_p8 = por %p514_p7, %p513_p6 }
  0x12   :  { %p516_p9 = pnand %p515_p8, %p509_p5 }
  0x14   :  { %519 = shalt.err (!%p516_p9)
}
  0x15   :  { %21 = dma.hbm_to_vmem [thread:$0]  %s730_s0, 192, %s19_s18, [#allocation3]  }
  0x16   :  { %s568_s25 = smov [#allocation7]  }
  0x17   :  { %s38_s26 = sshll.u32 %s568_s25, 4  ;;  %s39_s26 = int_to_ptr.vmem [resolvable:$true] %s38_s26 }
  0x18   :  { %s528_s27 = scalar_lea.vmem %s39_s26, 64  ;;  %p533_p11 = scmp.lt.s32.totalorder %s39_s26, %s39_s26 }
  0x19   :  { %p529_p10 = scmp.ne.s32.totalorder %s39_s26, %s528_s27  ;;  %p534_p12 = scmp.lt.s32.totalorder %s528_s27, %s528_s27 }
  0x1b   :  { %p535_p13 = por %p534_p12, %p533_p11 }
  0x1d   :  { %p536_p0 = pnand %p535_p13, %p529_p10 }
  0x1f   :  { %539 = shalt.err (!%p536_p0)
}
  0x20   :  { %41 = dma.hbm_to_vmem [thread:$0]  %s732_s2, 64, %s39_s26, [#allocation6]  }
  0x21   :  { %560 = dma.done.wait [#allocation3], 192  }
  0x22   :  { %561 = vsyncadd [#allocation3], 4294967104 }
  0x23   :  { %562 = dma.done.wait [#allocation6], 192  }
  0x24   :  { %563 = vsyncadd [#allocation6], 4294967104  ;;  %v569_v0 = vmov 2   ;;  %v570_v1 = vmov 0   ;;  %v62_v2 = vld [vmem:[#allocation5] sm:$0xff]  ;;  %v54_v3 = vld [vmem:[#allocation2] sm:$0xff]  ;;  %v77_v32 = vlaneseq }
  0x25   :  { %431 = vset.pattern.permute.xlu1 %v569_v0  ;;  %429 = vset.pattern.permute.xlu0 %v570_v1  ;;  %v55_v4 = vld [vmem:[#allocation2 + $0x8] sm:$0xf]  ;;  %v56_v5 = vunpack.c.l.bf16 %v54_v3  ;;  %v57_v6 = vunpack.c.h.bf16 %v54_v3  ;;  %v571_v10 = vmov 1   ;;  %s572_s0 = smov 126   ;;  %v573_v13 = vmov 3   ;;  %s574_s2 = smov 124  }
  0x26   :  { %283 = vmatprep.mubr.bf16.mxu0 %v570_v1  ;;  %104 = vperm.xlu1 %431, %v62_v2   ;;  %v58_v9 = vunpack.c.l.bf16 %v55_v4  ;;  %v575_v14 = vmov 4   ;;  %v576_v15 = vmov 5   ;;  %s577_s29 = smov 104   ;;  %v578_v16 = vmov 6   ;;  %s580_s30 = smov 102  }
  0x27   :  { %65 = vperm.xlu0 %429, %v62_v2   ;;  %v623_v7 = vmax.f32 %v56_v5, 0.0  ;;  %v625_v8 = vmax.f32 %v57_v6, 0.0  ;;  %v579_v17 = vmov 7   ;;  %v581_v18 = vmov 8   ;;  %s582_s5 = smov 100   ;;  %s583_s6 = smov 76  }
  0x28   :  { %v629_v12 = vmax.f32 %v58_v9, 0.0  ;;  %s584_s7 = smov 80   ;;  %s585_s8 = smov 78   ;;  %v586_v19 = vmov 0.0   ;;  %vm587_vm0 = vmmov 0   ;;  %v648_v35 = vand.u32 127, %v77_v32 }
  0x29   :  { %v433_v11 = vpack.i.bf16 %v625_v8, %v623_v7  ;;  %400 = vmatprep.subr.bf16.mxu1 %v586_v19  ;;  %402 = vmatprep.mubr.msk.bf16.mxu1 %vm587_vm0, %v586_v19  ;;  %vm241_vm9 = vcmask 1043456   ;;  %vm237_vm10 = vcmask 64512  }
  0x2a   :  { %vm79_vm1 = vcmp.lt.s32.totalorder %v648_v35, 126  ;;  %vm99_vm2 = vcmp.lt.s32.totalorder %v648_v35, 124  ;;  %vm119_vm3 = vcmp.lt.s32.totalorder %v648_v35, 104  ;;  %vm139_vm4 = vcmp.lt.s32.totalorder %v648_v35, 102 }
  0x2b   :  { %430 = vset.pattern.permute.xlu0 %v571_v10  ;;  %434 = vrot.lane.b32.xlu1 %v433_v11, %s572_s0  ;;  %vm159_vm5 = vcmp.lt.s32.totalorder %v648_v35, 100  ;;  %vm179_vm6 = vcmp.lt.s32.totalorder %v648_v35, 80  ;;  %vm199_vm7 = vcmp.lt.s32.totalorder %v648_v35, 78  ;;  %vm219_vm8 = vcmp.lt.s32.totalorder %v648_v35, 76 }
  0x2c   :  { %84 = vperm.xlu0 %430, %v62_v2   ;;  %v335_v35 = vshrl.u32 %v77_v32, 7 }
  0x2f   :  { %75 = vrot.lane.b32.xlu1 %v629_v12, %s572_s0 }
  0x30   :  { %432 = vset.pattern.permute.xlu0 %v573_v13 }
  0x31   :  { %124 = vperm.xlu0 %432, %v62_v2  }
  0x33   :  { %439 = vrot.lane.b32.xlu1 %v433_v11, %s574_s2 }
  0x35   :  { %443 = vset.pattern.permute.xlu0 %v575_v14 }
  0x36   :  { %144 = vperm.xlu0 %443, %v62_v2  }
  0x37   :  { %97 = vrot.lane.b32.xlu1 %v629_v12, %s574_s2 }
  0x3a   :  { %449 = vset.pattern.permute.xlu0 %v576_v15 }
  0x3b   :  { %164 = vperm.xlu0 %449, %v62_v2   ;;  %445 = vrot.lane.b32.xlu1 %v433_v11, %s577_s29 }
  0x3f   :  { %455 = vset.pattern.permute.xlu0 %v578_v16  ;;  %117 = vrot.lane.b32.xlu1 %v629_v12, %s577_s29 }
  0x40   :  { %184 = vperm.xlu0 %455, %v62_v2  }
  0x43   :  { %451 = vrot.lane.b32.xlu1 %v433_v11, %s580_s30 }
  0x44   :  { %461 = vset.pattern.permute.xlu0 %v579_v17 }
  0x45   :  { %204 = vperm.xlu0 %461, %v62_v2  }
  0x47   :  { %137 = vrot.lane.b32.xlu1 %v629_v12, %s580_s30 }
  0x49   :  { %467 = vset.pattern.permute.xlu0 %v581_v18 }
  0x4a   :  { %224 = vperm.xlu0 %467, %v62_v2  }
  0x4b   :  { %457 = vrot.lane.b32.xlu1 %v433_v11, %s582_s5 }
  0x4e   :  { %474 = vrot.lane.b32.xlu0 %v433_v11, %s583_s6 }
  0x4f   :  { %157 = vrot.lane.b32.xlu1 %v629_v12, %s582_s5 }
  0x53   :  { %463 = vrot.lane.b32.xlu1 %v433_v11, %s584_s7 }
  0x57   :  { %177 = vrot.lane.b32.xlu1 %v629_v12, %s584_s7 }
  0x5b   :  { %469 = vrot.lane.b32.xlu1 %v433_v11, %s585_s8 }
  0x5f   :  { %197 = vrot.lane.b32.xlu1 %v629_v12, %s585_s8 }
  0x63   :  { %217 = vrot.lane.b32.xlu1 %v629_v12, %s583_s6 }
  0xa1   :  { %v105_v20 = vpop.permute.xlu1 %104 }
  0xa2   :  { %v66_v21 = vpop.permute.xlu0 %65 }
  0xa3   :  { %v68_v48 = vmul.f32 %v66_v21, %v623_v7  ;;  %v69_v57 = vmul.f32 %v66_v21, %v625_v8  ;;  %v70_v58 = vmul.f32 %v66_v21, %v629_v12 }
  0xa5   :  { %v435_v22 = vpop.permute.xlu1 %434 }
  0xa6   :  { %v437_v37 = vunpack.i.h.bf16 %v435_v22  ;;  %v436_v38 = vunpack.i.l.bf16 %v435_v22 }
  0xa7   :  { %v85_v24 = vpop.permute.xlu0 %84 }
  0xa8   :  { %v81_v43 = vsel %vm79_vm1, %v436_v38, %v437_v37 }
  0xa9   :  { %v76_v23 = vpop.permute.xlu1 %75  ;;  %v87_v49 = vmul.f32 %v85_v24, %v81_v43 }
  0xaa   :  { %v80_v44 = vsel %vm79_vm1, %v437_v37, %v76_v23  ;;  %v82_v45 = vsel %vm79_vm1, %v76_v23, %v436_v38 }
  0xab   :  { %v88_v59 = vmul.f32 %v85_v24, %v80_v44  ;;  %v89_v60 = vmul.f32 %v85_v24, %v82_v45  ;;  %v90_v1 = vadd.f32 %v87_v49, %v68_v48 }
  0xac   :  { %v639_v26 = vpop.permute.xlu0 %124 }
  0xad   :  { %v440_v25 = vpop.permute.xlu1 %439  ;;  %v91_v10 = vadd.f32 %v88_v59, %v69_v57  ;;  %v92_v12 = vadd.f32 %v89_v60, %v70_v58 }
  0xae   :  { %v442_v40 = vunpack.i.h.bf16 %v440_v25  ;;  %v441_v41 = vunpack.i.l.bf16 %v440_v25 }
  0xb0   :  { %v101_v50 = vsel %vm99_vm2, %v441_v41, %v442_v40 }
  0xb1   :  { %v98_v27 = vpop.permute.xlu1 %97  ;;  %v641_v28 = vpop.permute.xlu0 %144  ;;  %v107_v61 = vmul.f32 %v105_v20, %v101_v50 }
  0xb2   :  { %v100_v52 = vsel %vm99_vm2, %v442_v40, %v98_v27  ;;  %v102_v53 = vsel %vm99_vm2, %v98_v27, %v441_v41 }
  0xb3   :  { %v108_v2 = vmul.f32 %v105_v20, %v100_v52  ;;  %v109_v3 = vmul.f32 %v105_v20, %v102_v53  ;;  %v110_v13 = vadd.f32 %v107_v61, %v90_v1 }
  0xb5   :  { %v446_v29 = vpop.permute.xlu1 %445  ;;  %v111_v22 = vadd.f32 %v108_v2, %v91_v10  ;;  %v112_v23 = vadd.f32 %v109_v3, %v92_v12 }
  0xb6   :  { %v643_v30 = vpop.permute.xlu0 %164  ;;  %v448_v46 = vunpack.i.h.bf16 %v446_v29  ;;  %v447_v47 = vunpack.i.l.bf16 %v446_v29 }
  0xb8   :  { %v121_v62 = vsel %vm119_vm3, %v447_v47, %v448_v46 }
  0xb9   :  { %v118_v31 = vpop.permute.xlu1 %117  ;;  %v127_v11 = vmul.f32 %v639_v26, %v121_v62 }
  0xba   :  { %v120_v4 = vsel %vm119_vm3, %v448_v46, %v118_v31  ;;  %v122_v6 = vsel %vm119_vm3, %v118_v31, %v447_v47 }
  0xbb   :  { %v645_v34 = vpop.permute.xlu0 %184  ;;  %v128_v14 = vmul.f32 %v639_v26, %v120_v4  ;;  %v129_v17 = vmul.f32 %v639_v26, %v122_v6  ;;  %v130_v27 = vadd.f32 %v127_v11, %v110_v13 }
  0xbd   :  { %v452_v33 = vpop.permute.xlu1 %451  ;;  %v132_v40 = vadd.f32 %v129_v17, %v112_v23 }
  0xbe   :  { %v454_v54 = vunpack.i.h.bf16 %v452_v33  ;;  %v453_v55 = vunpack.i.l.bf16 %v452_v33  ;;  %v131_v33 = vadd.f32 %v128_v14, %v111_v22 }
  0xc0   :  { %v651_v39 = vpop.permute.xlu0 %204  ;;  %v141_v7 = vsel %vm139_vm4, %v453_v55, %v454_v54 }
  0xc1   :  { %v138_v36 = vpop.permute.xlu1 %137  ;;  %v147_v18 = vmul.f32 %v641_v28, %v141_v7 }
  0xc2   :  { %v140_v19 = vsel %vm139_vm4, %v454_v54, %v138_v36  ;;  %v142_v20 = vsel %vm139_vm4, %v138_v36, %v453_v55 }
  0xc3   :  { %v148_v37 = vmul.f32 %v641_v28, %v140_v19  ;;  %v149_v38 = vmul.f32 %v641_v28, %v142_v20  ;;  %v150_v41 = vadd.f32 %v147_v18, %v130_v27  ;;  %v233_v18 = vld [vmem:[#allocation7] sm:$0xf]  ;;  %v336_v19 = vsub.s32 0, %v335_v35 }
  0xc4   :  { %v340_v20 = vsub.s32 1, %v335_v35 }
  0xc5   :  { %v653_v42 = vpop.permute.xlu1 %457  ;;  %v661_v56 = vpop.permute.xlu0 %224  ;;  %v152_v52 = vadd.f32 %v149_v38, %v132_v40 }
  0xc6   :  { %v460_v63 = vunpack.i.h.bf16 %v653_v42  ;;  %v459_v0 = vunpack.i.l.bf16 %v653_v42 }
  0xc8   :  { %v161_v15 = vsel %vm159_vm5, %v459_v0, %v460_v63 }
  0xc9   :  { %v158_v51 = vpop.permute.xlu1 %157  ;;  %v475_v16 = vpop.permute.xlu0 %474  ;;  %v167_v26 = vmul.f32 %v643_v30, %v161_v15 }
  0xca   :  { %v160_v24 = vsel %vm159_vm5, %v460_v63, %v158_v51  ;;  %v477_v29 = vunpack.i.h.bf16 %v475_v16  ;;  %v476_v31 = vunpack.i.l.bf16 %v475_v16  ;;  %v162_v36 = vsel %vm159_vm5, %v158_v51, %v459_v0 }
  0xcb   :  { %v168_v42 = vmul.f32 %v643_v30, %v160_v24  ;;  %v169_v28 = vmul.f32 %v643_v30, %v162_v36  ;;  %v170_v49 = vadd.f32 %v167_v26, %v150_v41  ;;  %v151_v51 = vadd.f32 %v148_v37, %v131_v33 }
  0xcc   :  { %v221_v50 = vsel %vm219_vm8, %v476_v31, %v477_v29 }
  0xcd   :  { %v464_v5 = vpop.permute.xlu1 %463  ;;  %v171_v60 = vadd.f32 %v168_v42, %v151_v51  ;;  %v227_v62 = vmul.f32 %v661_v56, %v221_v50  ;;  %v172_v63 = vadd.f32 %v169_v28, %v152_v52 }
  0xce   :  { %v466_v8 = vunpack.i.h.bf16 %v464_v5  ;;  %v465_v9 = vunpack.i.l.bf16 %v464_v5 }
  0xd0   :  { %v181_v25 = vsel %vm179_vm6, %v465_v9, %v466_v8 }
  0xd1   :  { %v178_v21 = vpop.permute.xlu1 %177  ;;  %v187_v43 = vmul.f32 %v645_v34, %v181_v25 }
  0xd2   :  { %v180_v45 = vsel %vm179_vm6, %v466_v8, %v178_v21  ;;  %v182_v46 = vsel %vm179_vm6, %v178_v21, %v465_v9  ;;  %v332_v21 = vld [vmem:[%s733_s3] sm:$0x7]  ;;  %s588_s3 = smov [#allocation8]  }
  0xd3   :  { %v188_v54 = vmul.f32 %v645_v34, %v180_v45  ;;  %v189_v55 = vmul.f32 %v645_v34, %v182_v46  ;;  %v190_v58 = vadd.f32 %v187_v43, %v170_v49  ;;  %v337_v22 = vrot.slane %v332_v21, %v336_v19  ;;  %s385_s11 = sshll.u32 %s588_s3, 4  ;;  %s386_s11 = int_to_ptr.vmem [resolvable:$true] %s385_s11 }
  0xd4   :  { %v341_v24 = vrot.slane %v332_v21, %v340_v20  ;;  %s540_s12 = scalar_lea.vmem %s386_s11, 384  ;;  %p545_p2 = scmp.lt.s32.totalorder %s386_s11, %s386_s11 }
  0xd5   :  { %v470_v44 = vpop.permute.xlu1 %469  ;;  %v191_v34 = vadd.f32 %v188_v54, %v171_v60  ;;  %v192_v3 = vadd.f32 %v189_v55, %v172_v63  ;;  %p541_p1 = scmp.ne.s32.totalorder %s386_s11, %s540_s12  ;;  %p546_p3 = scmp.lt.s32.totalorder %s540_s12, %s540_s12 }
  0xd6   :  { %v472_v47 = vunpack.i.h.bf16 %v470_v44  ;;  %v471_v48 = vunpack.i.l.bf16 %v470_v44 }
  0xd7   :  { %p547_p4 = por %p546_p3, %p545_p2 }
  0xd8   :  { %v201_v53 = vsel %vm199_vm7, %v471_v48, %v472_v47 }
  0xd9   :  { %v198_v57 = vpop.permute.xlu1 %197  ;;  %v207_v59 = vmul.f32 %v651_v39, %v201_v53  ;;  %p548_p5 = pnand %p547_p4, %p541_p1 }
  0xda   :  { %v200_v30 = vsel %vm199_vm7, %v472_v47, %v198_v57  ;;  %v202_v61 = vsel %vm199_vm7, %v198_v57, %v471_v48 }
  0xdb   :  { %v208_v0 = vmul.f32 %v651_v39, %v200_v30  ;;  %v209_v1 = vmul.f32 %v651_v39, %v202_v61  ;;  %v210_v2 = vadd.f32 %v207_v59, %v190_v58 }
  0xdd   :  { %v218_v4 = vpop.permute.xlu1 %217  ;;  %v230_v5 = vadd.f32 %v227_v62, %v210_v2  ;;  %v212_v8 = vadd.f32 %v209_v1, %v192_v3  ;;  %v211_v11 = vadd.f32 %v208_v0, %v191_v34 }
  0xde   :  { %v220_v6 = vsel %vm219_vm8, %v477_v29, %v218_v4  ;;  %v222_v7 = vsel %vm219_vm8, %v218_v4, %v476_v31 }
  0xdf   :  { %v228_v9 = vmul.f32 %v661_v56, %v220_v6  ;;  %v229_v10 = vmul.f32 %v661_v56, %v222_v7  ;;  %v234_v13 = vpack.c.bf16 %v230_v5, %v230_v5  ;;  %v344_v56 = vsub.s32 2, %v335_v35 }
  0xe1   :  { %v231_v12 = vadd.f32 %v228_v9, %v211_v11  ;;  %v232_v39 = vadd.f32 %v229_v10, %v212_v8  ;;  %v243_v16 = vsel %vm241_vm9, %v234_v13, 0  ;;  %v345_v23 = vrot.slane %v332_v21, %v344_v56 }
  0xe3   :  { %v235_v14 = vpack.c.bf16 %v231_v12, %v231_v12  ;;  %v236_v15 = vpack.c.bf16 %v232_v39, %v232_v39 }
  0xe5   :  { %395 = vmatprep.subr.msk.bf16.mxu0 %vm241_vm9, %v235_v14  ;;  %v249_v17 = vsel %vm241_vm9, %v236_v15, 0 }
  0xe6   :  { %266 = vmatpush1.bf16.msra.mxu0 %v243_v16  ;;  %401 = vmatpush3.bf16.msra.mxu1 %v249_v17 }
  0xe9   :  { %396 = vmatmul.mubr.msk.bf16.vlgmr.msra.gmra.mxu0 %vm237_vm10, %v233_v18  ;;  %403 = vmatmul.mubr.msk.bf16.vlgmr.msra.gmra.mxu1 %vm237_vm10, %v233_v18 }
 0x1a9   :  { %v285_v25 = vpop.f32.mrf.mxu0  ;;  %v326_v27 = vpop.f32.mrf.mxu1 }
 0x1aa   :  { %v349_v31 = vmul.f32 %v337_v22, %v285_v25  ;;  %v351_v33 = vmul.f32 %v345_v23, %v326_v27 }
 0x1ab   :  { %v287_v26 = vpop.f32.mrf.mxu0  ;;  %v404_v29 = vpop.f32.mrf.mxu1 }
 0x1ac   :  { %v350_v37 = vmul.f32 %v341_v24, %v287_v26 }
 0x1ad   :  { %v289_v38 = vpop.f32.mrf.mxu0  ;;  %v329_v36 = vpop.f32.mrf.mxu1 }
 0x1ae   :  { %v352_v32 = vadd.f32 %v350_v37, %v349_v31 }
 0x1af   :  { %v290_v40 = vpop.f32.mrf.mxu0  ;;  %v405_v41 = vpop.f32.mrf.mxu1 }
 0x1b0   :  { %v353_v42 = vadd.f32 %v352_v32, %v351_v33 }
 0x1b2   :  { %354 = vadd.xlane.f32.xlu0 %v353_v42 }
 0x23b   :  { %v355_v43 = vpop.xlane.xlu0 %354 }
 0x23c   :  { %v356_v44 = vmul.f32 0.0078125, %v355_v43 }
 0x23e   :  { %v357_v45 = vsub.f32 %v349_v31, %v356_v44  ;;  %v358_v46 = vsub.f32 %v350_v37, %v356_v44  ;;  %v359_v47 = vsub.f32 %v351_v33, %v356_v44 }
 0x240   :  { %v360_v48 = vmul.f32 %v357_v45, %v337_v22  ;;  %v361_v28 = vmul.f32 %v358_v46, %v341_v24  ;;  %v362_v49 = vmul.f32 %v359_v47, %v345_v23 }
 0x242   :  { %v363_v50 = vmul.f32 %v360_v48, %v360_v48  ;;  %v364_v51 = vmul.f32 %v361_v28, %v361_v28  ;;  %v365_v52 = vmul.f32 %v362_v49, %v362_v49 }
 0x244   :  { %v366_v53 = vadd.f32 %v364_v51, %v363_v50 }
 0x246   :  { %v367_v54 = vadd.f32 %v366_v53, %v365_v52 }
 0x248   :  { %368 = vadd.xlane.f32.xlu1 %v367_v54 }
 0x2d1   :  { %v369_v55 = vpop.xlane.xlu1 %368 }
 0x2d2   :  { %v370_v57 = vmul.f32 0.0078125, %v369_v55 }
 0x2d4   :  { %v371_v58 = vadd.f32 1e-05, %v370_v57 }
 0x2d6   :  { %478 = vrsqrt.f32 %v371_v58 }
 0x2e3   :  { %v479_v59 = vpop.eup %478 }
 0x2e4   :  { %v373_v60 = vmul.f32 %v479_v59, %v360_v48  ;;  %v374_v30 = vmul.f32 %v479_v59, %v361_v28  ;;  %v375_v61 = vmul.f32 %v479_v59, %v362_v49 }
 0x2e6   :  { %376 = vst [vmem:[#allocation8] sm:$0xff] %v373_v60  ;;  %377 = vst [vmem:[#allocation8 + $0x8] sm:$0xff] %v374_v30 }
 0x2e7   :  { %378 = vst [vmem:[#allocation8 + $0x10] sm:$0xff] %v375_v61 }
 0x2e8   :  { %551 = shalt.err (!%p548_p5)
}
 0x2e9   :  { %388 = dma.vmem_to_hbm [thread:$0]  %s386_s11, 384, %s734_s4, [#allocation4]  }
 0x2ea   :  { %564 = dma.done.wait [#allocation4], 384  }
 0x2eb   :  { %565 = vsyncadd [#allocation4], 4294966912 }
 0x2ec   :  { %392 = vsyncpa [#allocation3], 1 }
 0x2ed   :  { %393 = vsyncpa [#allocation6], 1 }
 0x2ee   :  { %394 = vsyncpa [#allocation4], 1 }

</bundles_post_ra>
